<compile_context>
chip_gen: v6e
topology: v6e:2x2x1
jax: 0.10.0
libtpu: 0.0.40
codegen_flags: <defaults>
</compile_context>

<pallas_src>
import functools
import math
import random

import numpy as np
import jax
import jax.numpy as jnp
from jax import lax
from jax.experimental import pallas as pl
from jax.experimental.pallas import tpu as pltpu


def _pick_vmem_limit():
    try:
        kind = jax.devices()[0].device_kind.lower()
    except Exception:
        return 32 * 1024 * 1024
    if "v7" in kind:
        return 32 * 1024 * 1024          # v7x: 64 MiB physical per TC -> keep headroom
    return 64 * 1024 * 1024              # v5e/v6e: 128 MiB physical


_VMEM_LIMIT = _pick_vmem_limit()


def _round_up(x, m):
    return ((x + m - 1) // m) * m


def _cdiv(a, b):
    return -(-a // b)


def _cparams(*sem):
    return pltpu.CompilerParams(dimension_semantics=sem, vmem_limit_bytes=_VMEM_LIMIT)


def _choose_tm(m, cap=512):
    """Row-tile size: minimal 8-row padding, <= cap, and >=2 tiles when M > 64 so a
    'parallel' grid axis can be sharded across v7x's two TensorCores."""
    mp = _round_up(m, 8)
    if mp <= 64:
        return mp, mp
    nt = max(2, _cdiv(mp, cap))
    tm = _round_up(_cdiv(mp, nt), 8)
    mp = _round_up(mp, tm)
    return tm, mp


def _pad_rows(x, mp):
    m = x.shape[0]
    return x if mp == m else jnp.pad(x, ((0, mp - m), (0, 0)))


# ----------------------------------------------------------------------------
# Generic linear:  y = relu?(x @ w + b)   (full K / full N per block, M tiled)
# ----------------------------------------------------------------------------
def _linear_kernel(x_ref, w_ref, b_ref, o_ref, *, relu):
    y = jnp.dot(x_ref[...].astype(jnp.bfloat16), w_ref[...],
                preferred_element_type=jnp.float32) + b_ref[...]
    if relu:
        y = jnp.maximum(y, 0.0)
    o_ref[...] = y.astype(o_ref.dtype)


def pallas_linear(x, w, b=None, relu=False, out_dtype=jnp.float32):
    """x: (M, K) f32/bf16, w: (K, N) bf16 (pre-cast), b: (N,)/(1,N) f32 or None."""
    M, K = x.shape
    N = w.shape[1]
    tm, Mp = _choose_tm(M)
    xp = _pad_rows(x, Mp)
    if b is None:
        b = jnp.zeros((1, N), jnp.float32)
    b = b.reshape(1, N).astype(jnp.float32)
    out = pl.pallas_call(
        functools.partial(_linear_kernel, relu=relu),
        out_shape=jax.ShapeDtypeStruct((Mp, N), out_dtype),
        grid_spec=pltpu.PrefetchScalarGridSpec(
            num_scalar_prefetch=0, grid=(Mp // tm,),
            in_specs=[pl.BlockSpec((tm, K), lambda i: (i, 0)),
                      pl.BlockSpec((K, N), lambda i: (0, 0)),
                      pl.BlockSpec((1, N), lambda i: (0, 0))],
            out_specs=pl.BlockSpec((tm, N), lambda i: (i, 0))),
        compiler_params=_cparams("parallel"),
    )(xp, w, b)
    return out if Mp == M else out[:M]


# ----------------------------------------------------------------------------
# Fused Q/K/V projection (self-attn): 3 bf16 outputs, one kernel
# ----------------------------------------------------------------------------
def _qkv_kernel(xqk_ref, xv_ref, wq_ref, wk_ref, wv_ref, bq_ref, bk_ref, bv_ref,
                q_ref, k_ref, v_ref):
    xqk = xqk_ref[...].astype(jnp.bfloat16)
    xv = xv_ref[...].astype(jnp.bfloat16)
    q_ref[...] = (jnp.dot(xqk, wq_ref[...], preferred_element_type=jnp.float32)
                  + bq_ref[...]).astype(q_ref.dtype)
    k_ref[...] = (jnp.dot(xqk, wk_ref[...], preferred_element_type=jnp.float32)
                  + bk_ref[...]).astype(k_ref.dtype)
    v_ref[...] = (jnp.dot(xv, wv_ref[...], preferred_element_type=jnp.float32)
                  + bv_ref[...]).astype(v_ref.dtype)


def pallas_qkv_proj(xqk, xv, mp):
    M, E = xqk.shape
    tm, Mp = _choose_tm(M)
    xqk = _pad_rows(xqk, Mp)
    xv = _pad_rows(xv, Mp)
    row = pl.BlockSpec((tm, E), lambda i: (i, 0))
    wsp = pl.BlockSpec((E, E), lambda i: (0, 0))
    vec = pl.BlockSpec((1, E), lambda i: (0, 0))
    q, k, v = pl.pallas_call(
        _qkv_kernel,
        out_shape=(jax.ShapeDtypeStruct((Mp, E), jnp.bfloat16),
                   jax.ShapeDtypeStruct((Mp, E), jnp.bfloat16),
                   jax.ShapeDtypeStruct((Mp, E), jnp.bfloat16)),
        grid_spec=pltpu.PrefetchScalarGridSpec(
            num_scalar_prefetch=0, grid=(Mp // tm,),
            in_specs=[row, row, wsp, wsp, wsp, vec, vec, vec],
            out_specs=(row, row, row)),
        compiler_params=_cparams("parallel"),
    )(xqk, xv, mp["wq"], mp["wk"], mp["wv"], mp["bq"], mp["bk"], mp["bv"])
    if Mp != M:
        q, k, v = q[:M], k[:M], v[:M]
    return q, k, v


# ----------------------------------------------------------------------------
# Fused K/V projection (cross-attn): 2 bf16 outputs, one kernel
# ----------------------------------------------------------------------------
def _kv_kernel(x_ref, wk_ref, wv_ref, bk_ref, bv_ref, k_ref, v_ref):
    x = x_ref[...].astype(jnp.bfloat16)
    k_ref[...] = (jnp.dot(x, wk_ref[...], preferred_element_type=jnp.float32)
                  + bk_ref[...]).astype(k_ref.dtype)
    v_ref[...] = (jnp.dot(x, wv_ref[...], preferred_element_type=jnp.float32)
                  + bv_ref[...]).astype(v_ref.dtype)


def pallas_kv_proj(x, mp):
    M, E = x.shape
    tm, Mp = _choose_tm(M)
    x = _pad_rows(x, Mp)
    row = pl.BlockSpec((tm, E), lambda i: (i, 0))
    wsp = pl.BlockSpec((E, E), lambda i: (0, 0))
    vec = pl.BlockSpec((1, E), lambda i: (0, 0))
    k, v = pl.pallas_call(
        _kv_kernel,
        out_shape=(jax.ShapeDtypeStruct((Mp, E), jnp.bfloat16),
                   jax.ShapeDtypeStruct((Mp, E), jnp.bfloat16)),
        grid_spec=pltpu.PrefetchScalarGridSpec(
            num_scalar_prefetch=0, grid=(Mp // tm,),
            in_specs=[row, wsp, wsp, vec, vec],
            out_specs=(row, row)),
        compiler_params=_cparams("parallel"),
    )(x, mp["wk"], mp["wv"], mp["bk"], mp["bv"])
    if Mp != M:
        k, v = k[:M], v[:M]
    return k, v


# ----------------------------------------------------------------------------
# Attention core: lane-dense (L, E) layout, heads via per-head lane masks
# ----------------------------------------------------------------------------
def _attn_kernel(q_ref, k_ref, v_ref, m_ref, o_ref, *, scale, nhead):
    q = q_ref[0]                                        # (tl, E) bf16
    k = k_ref[0]                                        # (S, E)  bf16
    v = v_ref[0]                                        # (S, E)  bf16
    m = m_ref[0]                                        # (1, S)  f32 additive mask
    L, E = q.shape
    dh = E // nhead
    lane = lax.broadcasted_iota(jnp.int32, (1, E), 1)
    o = jnp.zeros((L, E), jnp.float32)
    # Static per-head loop.  Masking the E axis (instead of reshaping to a Dh=8 last
    # dim) keeps every operand lane-dense; the MXU cost is unchanged because both the
    # contraction (Dh vs E) and the output width sit far below the 128-wide tile.
    for h in range(nhead):
        hm = ((lane // dh) == h).astype(jnp.float32)     # (1, E) 0/1
        qh = q * hm.astype(q.dtype)
        s = lax.dot_general(qh, k, (((1,), (1,)), ((), ())),
                            preferred_element_type=jnp.float32) * scale   # (L, S)
        s = s + m
        s = s - jnp.max(s, axis=-1, keepdims=True)
        p = jnp.exp(s)
        p = p * pl.reciprocal(jnp.sum(p, axis=-1, keepdims=True), approx=True)
        oh = jnp.dot(p.astype(jnp.bfloat16), v, preferred_element_type=jnp.float32)
        o = o + oh * hm
    o_ref[0] = o.astype(o_ref.dtype)


def pallas_attention(qh, kh, vh, mask_add, nhead):
    """qh: (N, L, E) bf16; kh/vh: (Nk, S, E) bf16 with Nk in {1, N} (Nk=1 => shared
    K/V reused across the batch via a constant index_map); mask_add: (N, 1, S) f32."""
    # TODO(synk): for very large S on v7x (64 MiB VMEM) this should tile S with an
    # online-softmax (flash-style) loop; feature maps in this head are small enough
    # that the full (L, S) score block fits comfortably.
    N, L, E = qh.shape
    Nk, S, _ = kh.shape
    scale = 1.0 / math.sqrt(E // nhead)
    if L <= 128:
        tl, Lp = L, L
    else:
        tl, Lp = _choose_tm(L, cap=128)
    if Lp != L:
        qh = jnp.pad(qh, ((0, 0), (0, Lp - L), (0, 0)))
    kv_map = (lambda i, j: (0, 0, 0)) if Nk == 1 else (lambda i, j: (i, 0, 0))
    out = pl.pallas_call(
        functools.partial(_attn_kernel, scale=scale, nhead=nhead),
        out_shape=jax.ShapeDtypeStruct((N, Lp, E), jnp.bfloat16),
        grid_spec=pltpu.PrefetchScalarGridSpec(
            num_scalar_prefetch=0, grid=(N, Lp // tl),
            in_specs=[pl.BlockSpec((1, tl, E), lambda i, j: (i, j, 0)),
                      pl.BlockSpec((1, S, E), kv_map),
                      pl.BlockSpec((1, S, E), kv_map),
                      pl.BlockSpec((1, 1, S), lambda i, j: (i, 0, 0))],
            out_specs=pl.BlockSpec((1, tl, E), lambda i, j: (i, j, 0))),
        compiler_params=_cparams("parallel", "parallel"),
    )(qh, kh, vh, mask_add)
    return out[:, :L] if Lp != L else out


# ----------------------------------------------------------------------------
# Fused out_proj + residual add + LayerNorm
# ----------------------------------------------------------------------------
def _outproj_ln_kernel(a_ref, x_ref, w_ref, b_ref, g_ref, bt_ref, o_ref):
    y = jnp.dot(a_ref[...], w_ref[...], preferred_element_type=jnp.float32) + b_ref[...]
    y = y + x_ref[...]
    mu = jnp.mean(y, axis=-1, keepdims=True)
    var = jnp.mean(jnp.square(y - mu), axis=-1, keepdims=True)
    o_ref[...] = ((y - mu) * lax.rsqrt(var + 1e-5) * g_ref[...] + bt_ref[...]).astype(o_ref.dtype)


def pallas_outproj_ln(attn_out, resid, mp, norm_p):
    """attn_out: (M, E) bf16; resid: (M, E) f32 -> LN(resid + attn_out @ Wo + bo)."""
    M, E = attn_out.shape
    tm, Mp = _choose_tm(M)
    attn_out = _pad_rows(attn_out, Mp)
    resid = _pad_rows(resid, Mp)
    row = pl.BlockSpec((tm, E), lambda i: (i, 0))
    vec = pl.BlockSpec((1, E), lambda i: (0, 0))
    out = pl.pallas_call(
        _outproj_ln_kernel,
        out_shape=jax.ShapeDtypeStruct((Mp, E), jnp.float32),
        grid_spec=pltpu.PrefetchScalarGridSpec(
            num_scalar_prefetch=0, grid=(Mp // tm,),
            in_specs=[row, row, pl.BlockSpec((E, E), lambda i: (0, 0)), vec, vec, vec],
            out_specs=row),
        compiler_params=_cparams("parallel"),
    )(attn_out, resid, mp["wo"], mp["bo"], norm_p["g"], norm_p["b"])
    return out if Mp == M else out[:M]


# ----------------------------------------------------------------------------
# Fused FFN (linear1 -> ReLU -> linear2) + residual + LayerNorm
# ----------------------------------------------------------------------------
def _ffn_ln_kernel(x_ref, w1_ref, b1_ref, w2_ref, b2_ref, g_ref, bt_ref, o_ref):
    x = x_ref[...]
    h = jnp.dot(x.astype(jnp.bfloat16), w1_ref[...],
                preferred_element_type=jnp.float32) + b1_ref[...]
    h = jnp.maximum(h, 0.0)
    y = jnp.dot(h.astype(jnp.bfloat16), w2_ref[...],
                preferred_element_type=jnp.float32) + b2_ref[...]
    y = y + x
    mu = jnp.mean(y, axis=-1, keepdims=True)
    var = jnp.mean(jnp.square(y - mu), axis=-1, keepdims=True)
    o_ref[...] = ((y - mu) * lax.rsqrt(var + 1e-5) * g_ref[...] + bt_ref[...]).astype(o_ref.dtype)


def pallas_ffn_ln(x, p):
    """x: (M, E) f32 -> LN(x + W2 @ relu(W1 @ x + b1) + b2). Hidden stays in VMEM."""
    M, E = x.shape
    F = p["w1"].shape[1]
    tm, Mp = _choose_tm(M, cap=256)      # (tm, F) f32 hidden: <=2 MiB, fits all gens
    xp = _pad_rows(x, Mp)
    row = pl.BlockSpec((tm, E), lambda i: (i, 0))
    vecE = pl.BlockSpec((1, E), lambda i: (0, 0))
    out = pl.pallas_call(
        _ffn_ln_kernel,
        out_shape=jax.ShapeDtypeStruct((Mp, E), jnp.float32),
        grid_spec=pltpu.PrefetchScalarGridSpec(
            num_scalar_prefetch=0, grid=(Mp // tm,),
            in_specs=[row,
                      pl.BlockSpec((E, F), lambda i: (0, 0)),
                      pl.BlockSpec((1, F), lambda i: (0, 0)),
                      pl.BlockSpec((F, E), lambda i: (0, 0)),
                      vecE, vecE, vecE],
            out_specs=row),
        compiler_params=_cparams("parallel"),
    )(xp, p["w1"], p["b1"], p["w2"], p["b2"], p["norm"]["g"], p["norm"]["b"])
    return out if Mp == M else out[:M]


# ----------------------------------------------------------------------------
# Transformer building blocks (nn.MultiheadAttention semantics, seq-first)
# ----------------------------------------------------------------------------
def _make_mask_add(mask, N, S):
    if mask is None:
        return jnp.zeros((N, 1, S), jnp.float32)
    # NOTE: finite -1e9, so a fully-masked row degrades to uniform (PyTorch -> NaN).
    return jnp.where(jnp.asarray(mask, bool).reshape(N, 1, S), -1e9, 0.0).astype(jnp.float32)


def self_attn_layer(p, x, nhead, pos=None, mask=None):
    """SelfAttentionLayer: x = LN(x + MHA(x+pos, x+pos, x)).  x: (L, N, E) f32."""
    L, N, E = x.shape
    x2 = x.reshape(L * N, E)
    xqk2 = x2 if pos is None else (x + pos).reshape(L * N, E)
    q2, k2, v2 = pallas_qkv_proj(xqk2, x2, p["mha"])
    qh = q2.reshape(L, N, E).transpose(1, 0, 2)          # (N, L, E)  (L or N is 1 here)
    kh = k2.reshape(L, N, E).transpose(1, 0, 2)
    vh = v2.reshape(L, N, E).transpose(1, 0, 2)
    mask_add = _make_mask_add(mask, N, L)
    o = pallas_attention(qh, kh, vh, mask_add, nhead)    # (N, L, E) bf16
    o2 = o.transpose(1, 0, 2).reshape(L * N, E)
    out2 = pallas_outproj_ln(o2, x2, p["mha"], p["norm"])
    return out2.reshape(L, N, E)


def cross_attn_layer(p, q, kv, nhead, mask=None):
    """CrossAttentionLayer: q = LN(q + MHA(q, kv, kv)).  kv batch may be 1 (shared)."""
    L, N, E = q.shape
    S, Nk, _ = kv.shape
    q2 = q.reshape(L * N, E)
    qp = pallas_linear(q2, p["mha"]["wq"], p["mha"]["bq"], out_dtype=jnp.bfloat16)
    k2, v2 = pallas_kv_proj(kv.reshape(S * Nk, E), p["mha"])
    qh = qp.reshape(L, N, E).transpose(1, 0, 2)          # (N, L, E)
    kh = k2.reshape(S, Nk, E).transpose(1, 0, 2)         # (Nk, S, E)
    vh = v2.reshape(S, Nk, E).transpose(1, 0, 2)
    mask_add = _make_mask_add(mask, N, S)
    o = pallas_attention(qh, kh, vh, mask_add, nhead)
    o2 = o.transpose(1, 0, 2).reshape(L * N, E)
    out2 = pallas_outproj_ln(o2, q2, p["mha"], p["norm"])
    return out2.reshape(L, N, E)


def ffn_layer(p, x):
    L, N, E = x.shape
    return pallas_ffn_ln(x.reshape(L * N, E), p).reshape(L, N, E)


def mlp_forward_jnp(layers, x):
    """Tiny 3-layer weight MLP (32->32->32->2): plain XLA per the perf review."""
    for i, p in enumerate(layers):
        x = x @ p["w"] + p["b"]
        if i < len(layers) - 1:
            x = jnp.maximum(x, 0.0)
    return x


def sine_pos_embed(n, h, w, d_model):
    # TODO(synk): get_position_embedding is not defined in the reference file;
    # standard DETR PositionEmbeddingSine (normalize=True) assumed.
    num_pos_feats = d_model // 2
    temperature = 10000.0
    eps = 1e-6
    y_embed = jnp.cumsum(jnp.ones((n, h, w), jnp.float32), axis=1)
    x_embed = jnp.cumsum(jnp.ones((n, h, w), jnp.float32), axis=2)
    scale = 2.0 * math.pi
    y_embed = y_embed / (y_embed[:, -1:, :] + eps) * scale
    x_embed = x_embed / (x_embed[:, :, -1:] + eps) * scale
    dim_t = jnp.arange(num_pos_feats, dtype=jnp.float32)
    dim_t = temperature ** (2.0 * jnp.floor(dim_t / 2.0) / num_pos_feats)
    pos_x = x_embed[..., None] / dim_t
    pos_y = y_embed[..., None] / dim_t
    pos_x = jnp.stack([jnp.sin(pos_x[..., 0::2]), jnp.cos(pos_x[..., 1::2])], axis=4).reshape(n, h, w, -1)
    pos_y = jnp.stack([jnp.sin(pos_y[..., 0::2]), jnp.cos(pos_y[..., 1::2])], axis=4).reshape(n, h, w, -1)
    return jnp.concatenate([pos_y, pos_x], axis=3).transpose(0, 3, 1, 2)   # (n, d_model, h, w)


def self_attention_encoder(layers, src, nhead):
    """SelfAttention module (feature_encoder). src: (n, c, h, w) NCHW."""
    n, c, h, w = src.shape
    pos = sine_pos_embed(n, h, w, c)
    out = jnp.transpose(src.reshape(n, c, h * w), (2, 0, 1))          # (l, n, c)
    pos_emb = jnp.transpose(pos.reshape(n, c, h * w), (2, 0, 1))
    for p in layers:
        out = self_attn_layer(p["self"], out, nhead, pos=pos_emb)
        out = ffn_layer(p["ffn"], out)
    return jnp.transpose(out, (1, 2, 0)).reshape(n, c, h, w)


def mask_guide_attention(layers, q, kv, nhead, mask=None):
    """MaskGuideAttention. q: (qn, qc, 1, 1); kv: (1, kc, kh, kw) (single shared copy)."""
    qn, qc, qh_, qw_ = q.shape
    kn, kc, kh_, kw_ = kv.shape
    out = jnp.transpose(q.reshape(qn, qc, qh_ * qw_), (2, 0, 1))      # (l, qn, qc)
    kvs = jnp.transpose(kv.reshape(kn, kc, kh_ * kw_), (2, 0, 1))     # (s, kn, kc)
    for p in layers:
        out = self_attn_layer(p["self"], out, nhead, mask=None)
        out = cross_attn_layer(p["cross"], out, kvs, nhead, mask=mask)
        out = ffn_layer(p["ffn"], out)
    return jnp.transpose(out, (1, 2, 0)).reshape(qn, qc, qh_, qw_)


# ----------------------------------------------------------------------------
# roi_align (torchvision semantics, spatial_scale=1, sampling_ratio=-1,
# aligned=False) + MaxPool2d(roi_spatial) -- stays on device (JAX gather glue)
# ----------------------------------------------------------------------------
def _bilinear_gather(fmap, ys, xs):
    C, H, W = fmap.shape
    oob = (ys < -1.0) | (ys > H) | (xs < -1.0) | (xs > W)
    y = jnp.maximum(ys, 0.0)
    x = jnp.maximum(xs, 0.0)
    y0 = jnp.minimum(jnp.floor(y).astype(jnp.int32), H - 1)
    x0 = jnp.minimum(jnp.floor(x).astype(jnp.int32), W - 1)
    y1 = jnp.minimum(y0 + 1, H - 1)
    x1 = jnp.minimum(x0 + 1, W - 1)
    y = jnp.where(y0 >= H - 1, jnp.float32(H - 1), y)
    x = jnp.where(x0 >= W - 1, jnp.float32(W - 1), x)
    ly = y - y0.astype(jnp.float32)
    lx = x - x0.astype(jnp.float32)
    hy = 1.0 - ly
    hx = 1.0 - lx

    def g(yy, xx):
        return fmap[:, yy, xx]

    val = (hy * hx) * g(y0, x0) + (hy * lx) * g(y0, x1) \
        + (ly * hx) * g(y1, x0) + (ly * lx) * g(y1, x1)
    return jnp.where(oob[None], 0.0, val)


def roi_align_maxpool(feats, rois_scaled, pooled):
    """feats: (N,C,H,W); rois_scaled: numpy (K,5) [b,x1,y1,x2,y2] in feature coords."""
    K = rois_scaled.shape[0]
    r = np.asarray(rois_scaled, np.float64)
    b = r[:, 0].astype(np.int32)
    x1, y1, x2, y2 = r[:, 1], r[:, 2], r[:, 3], r[:, 4]
    roi_w = np.maximum(x2 - x1, 1.0)
    roi_h = np.maximum(y2 - y1, 1.0)
    bin_h = roi_h / pooled
    bin_w = roi_w / pooled
    gh = np.maximum(np.ceil(roi_h / pooled).astype(np.int64), 1)
    gw = np.maximum(np.ceil(roi_w / pooled).astype(np.int64), 1)
    Gh, Gw = int(gh.max()), int(gw.max())
    ph = np.arange(pooled)
    iy = np.arange(Gh)
    ix = np.arange(Gw)
    ys = (y1[:, None, None] + ph[None, :, None] * bin_h[:, None, None]
          + (iy[None, None, :] + 0.5) * bin_h[:, None, None] / gh[:, None, None])
    xs = (x1[:, None, None] + ph[None, :, None] * bin_w[:, None, None]
          + (ix[None, None, :] + 0.5) * bin_w[:, None, None] / gw[:, None, None])
    YY = np.broadcast_to(ys[:, :, None, :, None], (K, pooled, pooled, Gh, Gw)).astype(np.float32)
    XX = np.broadcast_to(xs[:, None, :, None, :], (K, pooled, pooled, Gh, Gw)).astype(np.float32)
    valid = ((iy[None, :, None] < gh[:, None, None])
             & (ix[None, None, :] < gw[:, None, None])).astype(np.float32)
    count = np.maximum(gh * gw, 1).astype(np.float32)

    fsel = feats[jnp.asarray(b)]
    vals = jax.vmap(_bilinear_gather)(fsel, jnp.asarray(YY), jnp.asarray(XX))
    vals = vals * jnp.asarray(valid)[:, None, None, None, :, :]
    pooled_avg = vals.sum(axis=(-2, -1)) / jnp.asarray(count)[:, None, None, None]
    return pooled_avg.max(axis=(2, 3))                                # (K, C)


# ----------------------------------------------------------------------------
# get_masked (host-side glue; inherently sequential Python RNG)
# ----------------------------------------------------------------------------
def get_masked(n, h, w, rois, beta, delta, rng):
    """Faithful reimplementation of FBILHead.get_masked (seeded RNG for determinism)."""
    a = np.array(rois, dtype=np.float64).copy()
    a[:, 1] = rois[:, 1] * w
    a[:, 2] = rois[:, 2] * h
    a[:, 3] = rois[:, 3] * w
    a[:, 4] = rois[:, 4] * h
    mask = np.zeros((n, h, w), dtype=bool)
    if n > 1:
        x1 = int(np.min(a[:, 1])); y1 = int(np.min(a[:, 2]))
        x2 = math.ceil(np.max(a[:, 3])); y2 = math.ceil(np.max(a[:, 4]))
    else:
        roi = a[0]
        cx = (roi[1] + roi[3]) / 2.0
        cy = (roi[2] + roi[4]) / 2.0
        rh = roi[4] - roi[2]
        rw = roi[3] - roi[1]
        x1 = cx - rw if cx - rw > 0 else 0.0
        y1 = cy - rh if cy - rh > 0 else 0.0
        x2 = cx + rw if cx + rw < w else w
        y2 = cy + rh if cy + rh < h else h
        x1, y1, x2, y2 = int(x1), int(y1), math.ceil(x2), math.ceil(y2)
    area1, area2 = [], []
    for i in range(w):
        for j in range(h):
            if i >= x1 and i <= x2 and j >= y1 and j <= y2:
                area1.append((i, j))
            else:
                area2.append((i, j))
    num_area1 = int(len(area1) * beta)
    num_area2 = int(len(area2) * delta)
    for _ in range(num_area1):
        idx = rng.randint(0, len(area1) - 1)
        x, y = area1[idx]
        mask[:, y, x] = True
        area1.pop(idx)
    for _ in range(num_area2):
        idx = rng.randint(0, len(area2) - 1)
        x, y = area2[idx]
        mask[:, y, x] = True
        area2.pop(idx)
    return mask.reshape(n, -1)


# ----------------------------------------------------------------------------
# Parameters (PyTorch-layout init) + one-off kernel-friendly preprocessing
# ----------------------------------------------------------------------------
class KeyGen:
    def __init__(self, seed):
        self.key = jax.random.PRNGKey(seed)

    def __call__(self):
        self.key, k = jax.random.split(self.key)
        return k


def init_params(cfg):
    kg = KeyGen(42)
    D, F, Cw, nc = cfg["reduce_dim"], cfg["d_ffn"], cfg["width"], cfg["num_classes"]

    def uinit(shape):
        limit = math.sqrt(6.0 / (shape[0] + shape[-1]))
        return jax.random.uniform(kg(), shape, jnp.float32, -limit, limit)

    def ln_p():
        return dict(g=jnp.ones((D,), jnp.float32), b=jnp.zeros((D,), jnp.float32))

    def mha_p():
        return dict(in_proj_w=uinit((3 * D, D)), in_proj_b=jnp.zeros((3 * D,), jnp.float32),
                    out_proj_w=uinit((D, D)), out_proj_b=jnp.zeros((D,), jnp.float32))

    def attn_layer_p():
        return dict(mha=mha_p(), norm=ln_p())

    def ffn_p():
        return dict(w1=uinit((D, F)), b1=jnp.zeros((F,), jnp.float32),
                    w2=uinit((F, D)), b2=jnp.zeros((D,), jnp.float32), norm=ln_p())

    def encoder_p(depth):
        return [dict(self=attn_layer_p(), ffn=ffn_p()) for _ in range(depth)]

    def mga_p(depth):
        return [dict(self=attn_layer_p(), cross=attn_layer_p(), ffn=ffn_p()) for _ in range(depth)]

    return dict(
        conv_reduce_w=uinit((Cw, D)),          # 1x1 conv weight stored as (in, out)
        feature_encoder=encoder_p(cfg["e_depth"]),
        context_atten=mga_p(cfg["c_depth"]),
        local_atten=mga_p(cfg["l_depth"]),
        weight_linear=[dict(w=uinit((D, D)), b=jnp.zeros((D,), jnp.float32)),
                       dict(w=uinit((D, D)), b=jnp.zeros((D,), jnp.float32)),
                       dict(w=uinit((D, 2)), b=jnp.zeros((2,), jnp.float32))],
        norm=ln_p(),
        fc_w=uinit((2 * D, nc)),               # fc has bias=False
    )


def prepare_params(raw):
    """One-off weight prep (hoisted out of the forward path): transpose to (in, out),
    cast matmul operands to bf16, reshape biases / LN params to (1, E)."""
    def prep_ln(p):
        return dict(g=p["g"].reshape(1, -1).astype(jnp.float32),
                    b=p["b"].reshape(1, -1).astype(jnp.float32))

    def prep_mha(p):
        E = p["out_proj_w"].shape[0]
        w, b = p["in_proj_w"], p["in_proj_b"]
        return dict(
            wq=w[:E].T.astype(jnp.bfloat16), bq=b[:E].reshape(1, E).astype(jnp.float32),
            wk=w[E:2 * E].T.astype(jnp.bfloat16), bk=b[E:2 * E].reshape(1, E).astype(jnp.float32),
            wv=w[2 * E:].T.astype(jnp.bfloat16), bv=b[2 * E:].reshape(1, E).astype(jnp.float32),
            wo=p["out_proj_w"].T.astype(jnp.bfloat16),
            bo=p["out_proj_b"].reshape(1, E).astype(jnp.float32))

    def prep_ffn(p):
        return dict(w1=p["w1"].astype(jnp.bfloat16), b1=p["b1"].reshape(1, -1).astype(jnp.float32),
                    w2=p["w2"].astype(jnp.bfloat16), b2=p["b2"].reshape(1, -1).astype(jnp.float32),
                    norm=prep_ln(p["norm"]))

    def prep_attn_layer(p):
        return dict(mha=prep_mha(p["mha"]), norm=prep_ln(p["norm"]))

    def prep_enc(layers):
        return [dict(self=prep_attn_layer(l["self"]), ffn=prep_ffn(l["ffn"])) for l in layers]

    def prep_mga(layers):
        return [dict(self=prep_attn_layer(l["self"]), cross=prep_attn_layer(l["cross"]),
                     ffn=prep_ffn(l["ffn"])) for l in layers]

    return dict(
        conv_reduce_w=raw["conv_reduce_w"].astype(jnp.bfloat16),
        feature_encoder=prep_enc(raw["feature_encoder"]),
        context_atten=prep_mga(raw["context_atten"]),
        local_atten=prep_mga(raw["local_atten"]),
        weight_linear=raw["weight_linear"],
        norm=prep_ln(raw["norm"]),
        fc_w=raw["fc_w"].astype(jnp.bfloat16))


# ----------------------------------------------------------------------------
# FBILHead forward
# ----------------------------------------------------------------------------
def fbil_head_forward(params, data, cfg):
    D, nhead, rs = cfg["reduce_dim"], cfg["head"], cfg["roi_spatial"]
    feats_in = data["features"]
    if not isinstance(feats_in, list):
        feats_in = [feats_in]
    H, W = feats_in[0].shape[3:]
    # AdaptiveAvgPool3d((1, H, W)) on (N, C, T, H, W) == temporal mean
    feats = [jnp.mean(f, axis=2) for f in feats_in]
    feats = jnp.concatenate(feats, axis=1)                    # (N, width, H, W) NCHW
    N, Cw = feats.shape[:2]

    # conv_reduce (1x1 conv) as a Pallas matmul over channel tokens (NHWC rows)
    x_tok = jnp.transpose(feats, (0, 2, 3, 1)).reshape(N * H * W, Cw)
    x_tok = pallas_linear(x_tok, params["conv_reduce_w"])     # (N*H*W, D), no bias
    feats = jnp.transpose(x_tok.reshape(N, H, W, D), (0, 3, 1, 2))   # back to NCHW

    rois_np = np.asarray(data["rois"], dtype=np.float64)
    rois_re = rois_np.copy()                                  # normalized copy (rois + 0)
    rois_scaled = rois_np.copy()
    rois_scaled[:, 1] *= W
    rois_scaled[:, 2] *= H
    rois_scaled[:, 3] *= W
    rois_scaled[:, 4] *= H

    # roi_align + MaxPool2d(roi_spatial), on device (JAX bilinear gather)
    roi_feats = roi_align_maxpool(feats, rois_scaled, rs)     # (K, D)

    roi_ids = data["roi_ids"]
    sizes = data["sizes_before_padding"]
    rng = random.Random(0)   # deterministic stand-in for the unseeded `random` module
    high_order = []
    # TODO(synk): distinct (eff_h, eff_w, n_rois) retrace the kernels below; bucketing
    # plus key-padding masks would avoid recompiles without changing real-token math.
    for idx in range(feats.shape[0]):
        n_rois = roi_ids[idx + 1] - roi_ids[idx]
        if n_rois == 0:
            continue
        actor = roi_feats[roi_ids[idx]:roi_ids[idx + 1]]       # (n, D)
        actor4 = actor[:, :, None, None]                       # (n, D, 1, 1)
        eff_h = math.ceil(H * sizes[idx][1])
        eff_w = math.ceil(W * sizes[idx][0])
        batch_rois = rois_re[roi_ids[idx]:roi_ids[idx + 1]]

        # Encode the background ONCE per image (the reference repeats identical data
        # n_rois times through identical weights); the K/V index_map in the attention
        # kernel reuses the single encoded copy across ROIs.
        bg = self_attention_encoder(params["feature_encoder"],
                                    feats[idx][None, :, :eff_h, :eff_w], nhead)

        local_mask = get_masked(n_rois, eff_h, eff_w, batch_rois,
                                cfg["local_beta"], cfg["local_delta"], rng)
        global_mask = get_masked(n_rois, eff_h, eff_w, batch_rois,
                                 cfg["global_beta"], cfg["global_delta"], rng)

        l_feats = mask_guide_attention(params["local_atten"], actor4, bg, nhead,
                                       mask=jnp.asarray(global_mask))
        g_feats = mask_guide_attention(params["context_atten"], actor4, bg, nhead,
                                       mask=jnp.asarray(local_mask))
        l2 = l_feats[:, :, 0, 0]                               # (n, D)
        g2 = g_feats[:, :, 0, 0]

        # Tiny tail (weight MLP -> sigmoid -> weighted combine -> LayerNorm): plain XLA
        # per the perf review -- <10 KFLOP, pure launch overhead as a pallas_call.
        wgt = jax.nn.sigmoid(mlp_forward_jnp(params["weight_linear"], actor))   # (n, 2)
        final = l2 * wgt[:, 0:1] + g2 * wgt[:, 1:2]
        mu = jnp.mean(final, axis=-1, keepdims=True)
        var = jnp.mean(jnp.square(final - mu), axis=-1, keepdims=True)
        final = (final - mu) * lax.rsqrt(var + 1e-5) * params["norm"]["g"] + params["norm"]["b"]
        high_order.append(final)

    outputs = jnp.concatenate(high_order, axis=0).reshape(data["num_rois"], -1)
    outputs = jnp.concatenate([roi_feats, outputs], axis=1)    # (K, 2*D)
    # self.dp is None for dropout=0; fc has no bias
    outputs = pallas_linear(outputs, params["fc_w"])
    return {"outputs": outputs}


# ----------------------------------------------------------------------------
# Demo
# ----------------------------------------------------------------------------
if __name__ == "__main__":
    N, width, T, H, W = 2, 32, 4, 8, 8
    cfg = dict(width=width, reduce_dim=32, head=4, num_classes=8, roi_spatial=4,
               d_ffn=2048, e_depth=1, c_depth=1, l_depth=3,
               local_beta=0.9, local_delta=0.2, global_beta=0.2, global_delta=1.0)

    params = prepare_params(init_params(cfg))

    key = jax.random.PRNGKey(0)
    k_feat, _ = jax.random.split(key)
    features = jax.random.normal(k_feat, (N, width, T, H, W), jnp.float32)
    rois = jnp.array([[0, 0.10, 0.20, 0.60, 0.70],
                      [0, 0.30, 0.10, 0.90, 0.80],
                      [1, 0.20, 0.20, 0.80, 0.90]], jnp.float32)
    data = dict(features=[features], rois=rois, num_rois=3, roi_ids=[0, 2, 3],
                sizes_before_padding=[[1.0, 1.0], [0.75, 0.75]])

    out = fbil_head_forward(params, data, cfg)
    jax.block_until_ready(out["outputs"])
    assert out["outputs"].shape == (3, cfg["num_classes"])
    assert bool(jnp.all(jnp.isfinite(out["outputs"])))
    print("KERNEL_OK")
</pallas_src>

<mosaic_0001>
module attributes {stable_mosaic.version = 11 : i64} {
  func.func @_linear_kernel(%arg0: i32, %arg1: memref<64x32xf32, #tpu.memory_space<vmem>>, %arg2: memref<32x32xbf16, #tpu.memory_space<vmem>>, %arg3: memref<1x32xf32, #tpu.memory_space<vmem>>, %arg4: memref<64x32xf32, #tpu.memory_space<vmem>>) attributes {dimension_semantics = [#tpu.dimension_semantics<parallel>], iteration_bounds = array<i64: 2>, scalar_prefetch = 0 : i64, scratch_operands = 0 : i64, tpu.core_type = #tpu.core_type<tc>, window_params = [{transform_indices = @transform_0, window_bounds = array<i64: 64, 32>}, {pipeline_mode = #tpu.pipeline_mode<synchronous>, transform_indices = @transform_1, window_bounds = array<i64: 32, 32>}, {pipeline_mode = #tpu.pipeline_mode<synchronous>, transform_indices = @transform_2, window_bounds = array<i64: 1, 32>}, {transform_indices = @transform_3, window_bounds = array<i64: 64, 32>}]} {
    %c0 = arith.constant 0 : index
    %c0_0 = arith.constant 0 : index
    %0 = vector.load %arg1[%c0, %c0_0] : memref<64x32xf32, #tpu.memory_space<vmem>>, vector<64x32xf32>
    %1 = arith.truncf %0 : vector<64x32xf32> to vector<64x32xbf16>
    %c0_1 = arith.constant 0 : index
    %c0_2 = arith.constant 0 : index
    %2 = vector.load %arg2[%c0_1, %c0_2] : memref<32x32xbf16, #tpu.memory_space<vmem>>, vector<32x32xbf16>
    %cst = arith.constant dense<0.000000e+00> : vector<64x32xf32>
    %3 = tpu.matmul %1, %2, %cst {dimension_numbers = #tpu.dot_dimension_numbers<[1], [0], [0], [1], [0, 0, 1, 1], [], []>} : vector<64x32xbf16>, vector<32x32xbf16>, vector<64x32xf32> -> vector<64x32xf32>
    %c0_3 = arith.constant 0 : index
    %c0_4 = arith.constant 0 : index
    %4 = vector.load %arg3[%c0_3, %c0_4] : memref<1x32xf32, #tpu.memory_space<vmem>>, vector<1x32xf32>
    %5 = vector.broadcast %4 : vector<1x32xf32> to vector<64x32xf32>
    %6 = arith.addf %3, %5 : vector<64x32xf32>
    %c0_5 = arith.constant 0 : index
    %c0_6 = arith.constant 0 : index
    %7 = vector.load %arg4[%c0_5, %c0_6] : memref<64x32xf32, #tpu.memory_space<vmem>>, vector<64x32xf32>
    tpu.vector_store %arg4[%c0_5, %c0_6], %6 {strides = array<i32>} : memref<64x32xf32, #tpu.memory_space<vmem>>, vector<64x32xf32>,
    return
  }
  func.func @transform_0(%arg0: i32) -> (i32, i32) {
    %c0_i32 = arith.constant 0 : i32
    %c0_i32_0 = arith.constant 0 : i32
    return %arg0, %c0_i32 : i32, i32
  }
  func.func @transform_1(%arg0: i32) -> (i32, i32) {
    %c0_i32 = arith.constant 0 : i32
    %c0_i32_0 = arith.constant 0 : i32
    %c0_i32_1 = arith.constant 0 : i32
    return %c0_i32, %c0_i32_0 : i32, i32
  }
  func.func @transform_2(%arg0: i32) -> (i32, i32) {
    %c0_i32 = arith.constant 0 : i32
    %c0_i32_0 = arith.constant 0 : i32
    %c0_i32_1 = arith.constant 0 : i32
    return %c0_i32, %c0_i32_0 : i32, i32
  }
  func.func @transform_3(%arg0: i32) -> (i32, i32) {
    %c0_i32 = arith.constant 0 : i32
    %c0_i32_0 = arith.constant 0 : i32
    return %arg0, %c0_i32 : i32, i32
  }
}

</mosaic_0001>

<bundles_post_ra>
// kernel: tpu_custom_call.1
= control target key start
LH: loop header
LB: loop body
LE: loop exit
PB: predicated region body
PF: predicated region fallthrough
CT: control target
= control target key end

     0   :  { %s430_s12 = smov 0   ;;  %s468_s0 = inlined_call_operand.vmem [shape: f32[128,32], index: 0, kind: input, shape index: {}]   ;;  %s469_s1 = inlined_call_operand.vmem [shape: bf16[32,32], index: 1, kind: input, shape index: {}]   ;;  %s470_s2 = inlined_call_operand.vmem [shape: f32[1,32], index: 2, kind: input, shape index: {}]   ;;  %s471_s3 = inlined_call_operand.vmem [shape: f32[128,32], index: 3, kind: output, shape index: {}]  }
   0x1 LB: > { %s352_s13 = sadd.s32 4294967295, %s408_s12   ;;  %p356_p0 = scmp.ge.s32.totalorder %s408_s12, 1  ;;  %s408_s12 = sphi %s430_s12, %s13_s12  }
   0x2   : > { %p138_p1 = scmp.lt.s32.totalorder %s408_s12, 3 }
   0x4   : > { %p139_p2 = pnand %p356_p0, %p138_p1 }
   0x5   : > { %s357_s16 = sshll.u32 (!%p139_p2), %s352_s13, 3 }
   0x6   : > { %142 = sbr.rel (%p139_p2) target bundleno = 222 (0xde), region = 32  ;;  %p163_p3 = scmp.lt.s32.totalorder (!%p139_p2), %s357_s16, 15 }
   0xb   : > { %v400_v0 = vld [vmem:[%s469_s1 + $0x8] sm:$0xff]   ;;  %v401_v1 = vld [vmem:[%s469_s1] sm:$0xff]   ;;  %s473_s16 = smov (!%p163_p3, %s357_s16), 15  ;;  %vm210_vm0 = vcmask 261120  }
   0xc   : > { %376 = vmatprep.subr.bf16.mxu0 %v400_v0  ;;  %388 = vmatprep.subr.bf16.mxu1 %v400_v0  ;;  %s358_s19 = sshll.u32 %s473_s16, 3  ;;  %v361_v14 = vld [vmem:[%s470_s2] ss:$0 sm:$0xff] }
   0xd   : > { %377 = vmatpush3.bf16.msra.mxu0 %v400_v0  ;;  %390 = vmatpush3.bf16.msra.mxu1 %v400_v0  ;;  %s166_s22 = scalar_lea.vmem %s468_s0, %s358_s19  ;;  %s172_s27 = scalar_lea.vmem %s471_s3, %s358_s19 }
   0xe   : > { %378 = vmatprep.subr.bf16.mxu0 %v401_v1  ;;  %389 = vmatprep.subr.bf16.mxu1 %v401_v1  ;;  %v175_v2 = vld [vmem:[%s166_s22] sm:$0xff]  ;;  %v176_v3 = vld [vmem:[%s166_s22 + $0x8] sm:$0xff]  ;;  %v177_v7 = vld [vmem:[%s166_s22 + $0x10] sm:$0xff] }
   0xf   : > { %v179_v4 = vld [vmem:[%s166_s22 + $0x20] sm:$0xff]  ;;  %v183_v5 = vpack.c.bf16 %v176_v3, %v175_v2  ;;  %v180_v6 = vld [vmem:[%s166_s22 + $0x28] sm:$0xff]  ;;  %v178_v8 = vld [vmem:[%s166_s22 + $0x18] sm:$0xff] }
  0x10   : > { %v185_v9 = vpack.c.bf16 %v180_v6, %v179_v4  ;;  %v184_v10 = vpack.c.bf16 %v178_v8, %v177_v7  ;;  %v181_v11 = vld [vmem:[%s166_s22 + $0x30] sm:$0xff]  ;;  %v182_v12 = vld [vmem:[%s166_s22 + $0x38] sm:$0xff] }
  0x11   : > { %379 = vmatpush3.bf16.msra.mxu0 %v401_v1  ;;  %391 = vmatpush3.bf16.msra.mxu1 %v401_v1  ;;  %v186_v13 = vpack.c.bf16 %v182_v12, %v181_v11 }
  0x12   : > { %380 = vmatprep.mubr.msk.bf16.mxu0 %vm210_vm0, %v183_v5  ;;  %384 = vmatprep.mubr.msk.bf16.mxu1 %vm210_vm0, %v185_v9 }
  0x14   : > { %381 = vmatmul.mubr.msk.bf16.vlgmr.msra.gmra.mxu0 %vm210_vm0, %v184_v10  ;;  %385 = vmatmul.mubr.msk.bf16.vlgmr.msra.gmra.mxu1 %vm210_vm0, %v186_v13 }
  0xd4   : > { %v382_v15 = vpop.f32.mrf.mxu0  ;;  %v386_v17 = vpop.f32.mrf.mxu1 }
  0xd5   : > { %v266_v16 = vadd.f32 %v382_v15, %v361_v14  ;;  %v282_v18 = vadd.f32 %v386_v17, %v361_v14 }
  0xd6   : > { %v257_v19 = vpop.f32.mrf.mxu0  ;;  %v273_v21 = vpop.f32.mrf.mxu1 }
  0xd7   : > { %290 = vst.msk [vmem:[%s172_s27 + $0x10] sm:$0xff] %vm210_vm0, %v266_v16  ;;  %v258_v20 = vadd.f32 %v361_v14, %v257_v19  ;;  %294 = vst.msk [vmem:[%s172_s27 + $0x30] sm:$0xff] %vm210_vm0, %v282_v18  ;;  %v274_v22 = vadd.f32 %v361_v14, %v273_v21 }
  0xd8   : > { %v383_v23 = vpop.f32.mrf.mxu0  ;;  %v387_v25 = vpop.f32.mrf.mxu1 }
  0xd9   : > { %288 = vst.msk [vmem:[%s172_s27] sm:$0xff] %vm210_vm0, %v258_v20  ;;  %v269_v24 = vadd.f32 %v383_v23, %v361_v14  ;;  %292 = vst.msk [vmem:[%s172_s27 + $0x20] sm:$0xff] %vm210_vm0, %v274_v22  ;;  %v285_v26 = vadd.f32 %v387_v25, %v361_v14 }
  0xda   : > { %v260_v27 = vpop.f32.mrf.mxu0  ;;  %v276_v29 = vpop.f32.mrf.mxu1 }
  0xdb   : > { %291 = vst.msk [vmem:[%s172_s27 + $0x18] sm:$0xff] %vm210_vm0, %v269_v24  ;;  %v261_v28 = vadd.f32 %v361_v14, %v260_v27  ;;  %295 = vst.msk [vmem:[%s172_s27 + $0x38] sm:$0xff] %vm210_vm0, %v285_v26  ;;  %v277_v30 = vadd.f32 %v361_v14, %v276_v29 }
  0xdd   : > { %289 = vst.msk [vmem:[%s172_s27 + $0x8] sm:$0xff] %vm210_vm0, %v261_v28  ;;  %293 = vst.msk [vmem:[%s172_s27 + $0x28] sm:$0xff] %vm210_vm0, %v277_v30 }
  0xde PF: > { %s13_s12 = sadd.s32 1, %s408_s12  }
  0xdf   : > { %p10_p4 = scmp.ge.s32.totalorder %s13_s12, 4  }
  0xe1   :  { %12 = sbr.rel (!%p10_p4) target bundleno = 1 (0x1), region = 62 }

</bundles_post_ra>
